<compile_context>
chip_gen: v5e
topology: v5e:2x2
jax: 0.10.0
libtpu: 0.0.40
codegen_flags: <defaults>
</compile_context>

<pallas_src>
import jax
import jax.numpy as jnp
from jax.experimental import pallas as pl
from jax.experimental.pallas import tpu as pltpu

_LANE = 128
_SUBLANE = 8
_DEFAULT_BATCH_TILE = 16384   # rows per grid step; ~1 MiB/direction at D=16 f32

# Layers followed by a ReLU. Layer 2 (the 8->4 bottleneck) has no activation;
# layer 5 is followed by the Sigmoid applied at the end of the kernel.
_RELU_LAYERS = (0, 1, 3, 4)


def layer_dims(input_size):
    """(fan_in, fan_out) of every Linear in the encoder+decoder chain."""
    return ((input_size, 12), (12, 8), (8, 4), (4, 8), (8, 12), (12, input_size))


def _round_up(x, m):
    return ((x + m - 1) // m) * m


def _make_kernel(dims, p_feat, approx_sigmoid):
    d_out = dims[-1][1]

    def kernel(x_ref, w_ref, b_ref, o_ref):
        # Enter the lane-dense compute domain: (features, batch_tile), batch on
        # the lane axis.  The transpose runs on the XLU (separate issue slot).
        h = x_ref[...].astype(jnp.float32).T                 # (D, T)
        for l, (fan_in, fan_out) in enumerate(dims):
            w = w_ref[l]                                      # (p_feat, p_feat) zero-padded
            if l == 0 and fan_in != p_feat:
                w = w[:, :fan_in]                             # match (fan_in, T) input slab
            # Tiny (<=16x16) weight on the MXU, f32 accumulation.
            h = jnp.dot(w, h, preferred_element_type=jnp.float32) + b_ref[l]
            if l in _RELU_LAYERS:
                h = jnp.maximum(h, 0.0)
        if d_out != p_feat:
            h = h[:d_out, :]
        if approx_sigmoid:
            # exp + approximate reciprocal, both on the EUP slot.
            s = pl.reciprocal(1.0 + jnp.exp(-h), approx=True)
        else:
            s = 1.0 / (1.0 + jnp.exp(-h))
        # Back to the natural (batch_tile, D) layout for the store.
        o_ref[...] = s.T.astype(o_ref.dtype)

    return kernel


def pack_params(params, input_size):
    """Pack the 6 (W, b) pairs into two zero-padded VMEM-resident arrays.

    Weights stay in the PyTorch layout (out_features, in_features), which is
    exactly what the transposed-domain kernel needs (h_out = W @ h_in + b).
    Zero padding rows/cols are inert through matmul + zero bias + ReLU.
    """
    dims = layer_dims(input_size)
    n = len(dims)
    p_feat = _round_up(max(max(i, o) for i, o in dims), _SUBLANE)
    w_pack = jnp.zeros((n, p_feat, p_feat), jnp.float32)
    b_pack = jnp.zeros((n, p_feat, 1), jnp.float32)
    for l, ((fan_in, fan_out), (w, b)) in enumerate(zip(dims, params)):
        w_pack = w_pack.at[l, :fan_out, :fan_in].set(w.astype(jnp.float32))
        b_pack = b_pack.at[l, :fan_out, 0].set(b.astype(jnp.float32))
    return w_pack, b_pack


def ae_forward(x, params, *, batch_tile=None, approx_sigmoid=True):
    """AE.forward.  x: (batch, input_size).  params: 6x (W:(out,in), b:(out,))."""
    B, D = x.shape
    dims = layer_dims(D)
    w_pack, b_pack = pack_params(params, D)
    p_feat = w_pack.shape[1]

    # ---- batch tiling (natural layout, no host-side pad/transpose) ----------
    if batch_tile is None:
        batch_tile = _DEFAULT_BATCH_TILE
    batch_tile = min(batch_tile, B)
    if batch_tile != B and batch_tile % _SUBLANE != 0:
        raise ValueError(
            f"batch_tile={batch_tile} must be a multiple of {_SUBLANE} or cover "
            f"the whole batch")
    grid = (pl.cdiv(B, batch_tile),)   # ragged last block handled by Pallas clipping

    flops = 2 * sum(i * o for i, o in dims) * B          # 1280 flop / row
    cost = pl.CostEstimate(
        flops=flops,
        transcendentals=2 * D * B,                        # exp + reciprocal per output elem
        bytes_accessed=2 * B * D * 4 + (w_pack.size + b_pack.size) * 4)

    return pl.pallas_call(
        _make_kernel(dims, p_feat, approx_sigmoid),
        out_shape=jax.ShapeDtypeStruct((B, D), x.dtype),
        grid_spec=pltpu.PrefetchScalarGridSpec(
            num_scalar_prefetch=0,
            grid=grid,
            in_specs=[
                pl.BlockSpec((batch_tile, D), lambda i: (i, 0)),
                pl.BlockSpec(w_pack.shape, lambda i: (0, 0, 0)),   # VMEM-resident
                pl.BlockSpec(b_pack.shape, lambda i: (0, 0, 0)),   # VMEM-resident
            ],
            out_specs=pl.BlockSpec((batch_tile, D), lambda i: (i, 0)),
        ),
        compiler_params=pltpu.CompilerParams(
            dimension_semantics=("parallel",),            # megacore-shardable steps
            vmem_limit_bytes=48 * 1024 * 1024),
        cost_estimate=cost,
    )(x, w_pack, b_pack)


def init_params(key, input_size):
    """torch.nn.Linear default init: U(-1/sqrt(fan_in), 1/sqrt(fan_in)).

    Returns [(W, b)] with W: (out_features, in_features), b: (out_features,).
    """
    params = []
    for fan_in, fan_out in layer_dims(input_size):
        key, kw, kb = jax.random.split(key, 3)
        bound = 1.0 / (fan_in ** 0.5)
        w = jax.random.uniform(kw, (fan_out, fan_in), jnp.float32, -bound, bound)
        b = jax.random.uniform(kb, (fan_out,), jnp.float32, -bound, bound)
        params.append((w, b))
    return params


def ae_reference(x, params):
    """Plain-JAX reference matching the PyTorch forward."""
    acts = ["relu", "relu", None, "relu", "relu", "sigmoid"]
    h = x
    for (w, b), act in zip(params, acts):
        h = h @ w.T + b
        if act == "relu":
            h = jnp.maximum(h, 0.0)
        elif act == "sigmoid":
            h = jax.nn.sigmoid(h)
    return h


if __name__ == "__main__":
    key = jax.random.PRNGKey(0)
    kx, kp = jax.random.split(key)

    input_size = 16   # data[0].shape[0] from the DataLoader in the original module
    params = init_params(kp, input_size)

    # (1) default path: single full-extent block, natural layout in/out.
    x = jax.random.normal(kx, (256, input_size), jnp.float32)
    out = jax.block_until_ready(ae_forward(x, params))
    ref = ae_reference(x, params)
    assert out.shape == x.shape
    assert jnp.allclose(out, ref, atol=2e-3, rtol=2e-3), "mismatch (default)"

    # (2) multi-step grid with a ragged last tile (300 = 2*128 + 44): exercises
    #     the pipelined path and in-kernel handling of the partial edge block.
    x2 = jax.random.normal(kx, (300, input_size), jnp.float32)
    out2 = jax.block_until_ready(ae_forward(x2, params, batch_tile=128))
    assert jnp.allclose(out2, ae_reference(x2, params),
                        atol=2e-3, rtol=2e-3), "mismatch (ragged)"

    # (3) tiny batch + exact (non-approx) sigmoid path.
    x3 = jax.random.normal(kx, (8, input_size), jnp.float32)
    out3 = jax.block_until_ready(ae_forward(x3, params, approx_sigmoid=False))
    assert jnp.allclose(out3, ae_reference(x3, params),
                        atol=2e-3, rtol=2e-3), "mismatch (small/exact)"

    print("KERNEL_OK")
</pallas_src>

<mosaic_0001>
module attributes {stable_mosaic.version = 11 : i64} {
  func.func @kernel(%arg0: i32, %arg1: memref<256x16xf32, #tpu.memory_space<vmem>>, %arg2: memref<6x16x16xf32, #tpu.memory_space<vmem>>, %arg3: memref<6x16x1xf32, #tpu.memory_space<vmem>>, %arg4: memref<256x16xf32, #tpu.memory_space<vmem>>) attributes {dimension_semantics = [#tpu.dimension_semantics<parallel>], iteration_bounds = array<i64: 1>, scalar_prefetch = 0 : i64, scratch_operands = 0 : i64, tpu.core_type = #tpu.core_type<tc>, window_params = [{transform_indices = @transform_0, window_bounds = array<i64: 256, 16>}, {pipeline_mode = #tpu.pipeline_mode<synchronous>, transform_indices = @transform_1, window_bounds = array<i64: 6, 16, 16>}, {pipeline_mode = #tpu.pipeline_mode<synchronous>, transform_indices = @transform_2, window_bounds = array<i64: 6, 16, 1>}, {transform_indices = @transform_3, window_bounds = array<i64: 256, 16>}]} {
    %c0 = arith.constant 0 : index
    %c0_0 = arith.constant 0 : index
    %0 = vector.load %arg1[%c0, %c0_0] : memref<256x16xf32, #tpu.memory_space<vmem>>, vector<256x16xf32>
    %1 = tpu.transpose %0, [1, 0] : vector<256x16xf32> -> vector<16x256xf32>
    %c0_1 = arith.constant 0 : index
    %c0_2 = arith.constant 0 : index
    %c0_3 = arith.constant 0 : index
    %2 = vector.load %arg2[%c0_1, %c0_2, %c0_3] : memref<6x16x16xf32, #tpu.memory_space<vmem>>, vector<1x16x16xf32>
    %3 = vector.shape_cast %2 : vector<1x16x16xf32> to vector<16x16xf32>
    %cst = arith.constant dense<0.000000e+00> : vector<16x256xf32>
    %4 = tpu.matmul %3, %1, %cst {dimension_numbers = #tpu.dot_dimension_numbers<[1], [0], [0], [1], [0, 0, 1, 1], [], []>} : vector<16x16xf32>, vector<16x256xf32>, vector<16x256xf32> -> vector<16x256xf32>
    %c0_4 = arith.constant 0 : index
    %c0_5 = arith.constant 0 : index
    %c0_6 = arith.constant 0 : index
    %5 = vector.load %arg3[%c0_4, %c0_5, %c0_6] : memref<6x16x1xf32, #tpu.memory_space<vmem>>, vector<1x16x1xf32>
    %6 = vector.shape_cast %5 : vector<1x16x1xf32> to vector<16x1xf32>
    %7 = vector.broadcast %6 : vector<16x1xf32> to vector<16x256xf32>
    %8 = arith.addf %4, %7 : vector<16x256xf32>
    %cst_7 = arith.constant 0.000000e+00 : f32
    %9 = vector.broadcast %cst_7 : f32 to vector<16x256xf32>
    %10 = arith.maximumf %8, %9 : vector<16x256xf32>
    %c1 = arith.constant 1 : index
    %c0_8 = arith.constant 0 : index
    %c0_9 = arith.constant 0 : index
    %11 = vector.load %arg2[%c1, %c0_8, %c0_9] : memref<6x16x16xf32, #tpu.memory_space<vmem>>, vector<1x16x16xf32>
    %12 = vector.shape_cast %11 : vector<1x16x16xf32> to vector<16x16xf32>
    %cst_10 = arith.constant dense<0.000000e+00> : vector<16x256xf32>
    %13 = tpu.matmul %12, %10, %cst_10 {dimension_numbers = #tpu.dot_dimension_numbers<[1], [0], [0], [1], [0, 0, 1, 1], [], []>} : vector<16x16xf32>, vector<16x256xf32>, vector<16x256xf32> -> vector<16x256xf32>
    %c1_11 = arith.constant 1 : index
    %c0_12 = arith.constant 0 : index
    %c0_13 = arith.constant 0 : index
    %14 = vector.load %arg3[%c1_11, %c0_12, %c0_13] : memref<6x16x1xf32, #tpu.memory_space<vmem>>, vector<1x16x1xf32>
    %15 = vector.shape_cast %14 : vector<1x16x1xf32> to vector<16x1xf32>
    %16 = vector.broadcast %15 : vector<16x1xf32> to vector<16x256xf32>
    %17 = arith.addf %13, %16 : vector<16x256xf32>
    %cst_14 = arith.constant 0.000000e+00 : f32
    %18 = vector.broadcast %cst_14 : f32 to vector<16x256xf32>
    %19 = arith.maximumf %17, %18 : vector<16x256xf32>
    %c2 = arith.constant 2 : index
    %c0_15 = arith.constant 0 : index
    %c0_16 = arith.constant 0 : index
    %20 = vector.load %arg2[%c2, %c0_15, %c0_16] : memref<6x16x16xf32, #tpu.memory_space<vmem>>, vector<1x16x16xf32>
    %21 = vector.shape_cast %20 : vector<1x16x16xf32> to vector<16x16xf32>
    %cst_17 = arith.constant dense<0.000000e+00> : vector<16x256xf32>
    %22 = tpu.matmul %21, %19, %cst_17 {dimension_numbers = #tpu.dot_dimension_numbers<[1], [0], [0], [1], [0, 0, 1, 1], [], []>} : vector<16x16xf32>, vector<16x256xf32>, vector<16x256xf32> -> vector<16x256xf32>
    %c2_18 = arith.constant 2 : index
    %c0_19 = arith.constant 0 : index
    %c0_20 = arith.constant 0 : index
    %23 = vector.load %arg3[%c2_18, %c0_19, %c0_20] : memref<6x16x1xf32, #tpu.memory_space<vmem>>, vector<1x16x1xf32>
    %24 = vector.shape_cast %23 : vector<1x16x1xf32> to vector<16x1xf32>
    %25 = vector.broadcast %24 : vector<16x1xf32> to vector<16x256xf32>
    %26 = arith.addf %22, %25 : vector<16x256xf32>
    %c3 = arith.constant 3 : index
    %c0_21 = arith.constant 0 : index
    %c0_22 = arith.constant 0 : index
    %27 = vector.load %arg2[%c3, %c0_21, %c0_22] : memref<6x16x16xf32, #tpu.memory_space<vmem>>, vector<1x16x16xf32>
    %28 = vector.shape_cast %27 : vector<1x16x16xf32> to vector<16x16xf32>
    %cst_23 = arith.constant dense<0.000000e+00> : vector<16x256xf32>
    %29 = tpu.matmul %28, %26, %cst_23 {dimension_numbers = #tpu.dot_dimension_numbers<[1], [0], [0], [1], [0, 0, 1, 1], [], []>} : vector<16x16xf32>, vector<16x256xf32>, vector<16x256xf32> -> vector<16x256xf32>
    %c3_24 = arith.constant 3 : index
    %c0_25 = arith.constant 0 : index
    %c0_26 = arith.constant 0 : index
    %30 = vector.load %arg3[%c3_24, %c0_25, %c0_26] : memref<6x16x1xf32, #tpu.memory_space<vmem>>, vector<1x16x1xf32>
    %31 = vector.shape_cast %30 : vector<1x16x1xf32> to vector<16x1xf32>
    %32 = vector.broadcast %31 : vector<16x1xf32> to vector<16x256xf32>
    %33 = arith.addf %29, %32 : vector<16x256xf32>
    %cst_27 = arith.constant 0.000000e+00 : f32
    %34 = vector.broadcast %cst_27 : f32 to vector<16x256xf32>
    %35 = arith.maximumf %33, %34 : vector<16x256xf32>
    %c4 = arith.constant 4 : index
    %c0_28 = arith.constant 0 : index
    %c0_29 = arith.constant 0 : index
    %36 = vector.load %arg2[%c4, %c0_28, %c0_29] : memref<6x16x16xf32, #tpu.memory_space<vmem>>, vector<1x16x16xf32>
    %37 = vector.shape_cast %36 : vector<1x16x16xf32> to vector<16x16xf32>
    %cst_30 = arith.constant dense<0.000000e+00> : vector<16x256xf32>
    %38 = tpu.matmul %37, %35, %cst_30 {dimension_numbers = #tpu.dot_dimension_numbers<[1], [0], [0], [1], [0, 0, 1, 1], [], []>} : vector<16x16xf32>, vector<16x256xf32>, vector<16x256xf32> -> vector<16x256xf32>
    %c4_31 = arith.constant 4 : index
    %c0_32 = arith.constant 0 : index
    %c0_33 = arith.constant 0 : index
    %39 = vector.load %arg3[%c4_31, %c0_32, %c0_33] : memref<6x16x1xf32, #tpu.memory_space<vmem>>, vector<1x16x1xf32>
    %40 = vector.shape_cast %39 : vector<1x16x1xf32> to vector<16x1xf32>
    %41 = vector.broadcast %40 : vector<16x1xf32> to vector<16x256xf32>
    %42 = arith.addf %38, %41 : vector<16x256xf32>
    %cst_34 = arith.constant 0.000000e+00 : f32
    %43 = vector.broadcast %cst_34 : f32 to vector<16x256xf32>
    %44 = arith.maximumf %42, %43 : vector<16x256xf32>
    %c5 = arith.constant 5 : index
    %c0_35 = arith.constant 0 : index
    %c0_36 = arith.constant 0 : index
    %45 = vector.load %arg2[%c5, %c0_35, %c0_36] : memref<6x16x16xf32, #tpu.memory_space<vmem>>, vector<1x16x16xf32>
    %46 = vector.shape_cast %45 : vector<1x16x16xf32> to vector<16x16xf32>
    %cst_37 = arith.constant dense<0.000000e+00> : vector<16x256xf32>
    %47 = tpu.matmul %46, %44, %cst_37 {dimension_numbers = #tpu.dot_dimension_numbers<[1], [0], [0], [1], [0, 0, 1, 1], [], []>} : vector<16x16xf32>, vector<16x256xf32>, vector<16x256xf32> -> vector<16x256xf32>
    %c5_38 = arith.constant 5 : index
    %c0_39 = arith.constant 0 : index
    %c0_40 = arith.constant 0 : index
    %48 = vector.load %arg3[%c5_38, %c0_39, %c0_40] : memref<6x16x1xf32, #tpu.memory_space<vmem>>, vector<1x16x1xf32>
    %49 = vector.shape_cast %48 : vector<1x16x1xf32> to vector<16x1xf32>
    %50 = vector.broadcast %49 : vector<16x1xf32> to vector<16x256xf32>
    %51 = arith.addf %47, %50 : vector<16x256xf32>
    %cst_41 = arith.constant 0.000000e+00 : f32
    %52 = vector.broadcast %cst_41 : f32 to vector<16x256xf32>
    %53 = arith.subf %52, %51 : vector<16x256xf32>
    %54 = math.exp %53 : vector<16x256xf32>
    %cst_42 = arith.constant 1.000000e+00 : f32
    %55 = vector.broadcast %cst_42 : f32 to vector<16x256xf32>
    %56 = arith.addf %55, %54 : vector<16x256xf32>
    %57 = tpu.reciprocal %56 {approx = true} : vector<16x256xf32> -> vector<16x256xf32>
    %58 = tpu.transpose %57, [1, 0] : vector<16x256xf32> -> vector<256x16xf32>
    %c0_43 = arith.constant 0 : index
    %c0_44 = arith.constant 0 : index
    %59 = vector.load %arg4[%c0_43, %c0_44] : memref<256x16xf32, #tpu.memory_space<vmem>>, vector<256x16xf32>
    tpu.vector_store %arg4[%c0_43, %c0_44], %58 {strides = array<i32>} : memref<256x16xf32, #tpu.memory_space<vmem>>, vector<256x16xf32>,
    return
  }
  func.func @transform_0(%arg0: i32) -> (i32, i32) {
    %c0_i32 = arith.constant 0 : i32
    %c0_i32_0 = arith.constant 0 : i32
    return %arg0, %c0_i32 : i32, i32
  }
  func.func @transform_1(%arg0: i32) -> (i32, i32, i32) {
    %c0_i32 = arith.constant 0 : i32
    %c0_i32_0 = arith.constant 0 : i32
    %c0_i32_1 = arith.constant 0 : i32
    %c0_i32_2 = arith.constant 0 : i32
    return %c0_i32, %c0_i32_0, %c0_i32_1 : i32, i32, i32
  }
  func.func @transform_2(%arg0: i32) -> (i32, i32, i32) {
    %c0_i32 = arith.constant 0 : i32
    %c0_i32_0 = arith.constant 0 : i32
    %c0_i32_1 = arith.constant 0 : i32
    %c0_i32_2 = arith.constant 0 : i32
    return %c0_i32, %c0_i32_0, %c0_i32_1 : i32, i32, i32
  }
  func.func @transform_3(%arg0: i32) -> (i32, i32) {
    %c0_i32 = arith.constant 0 : i32
    %c0_i32_0 = arith.constant 0 : i32
    return %arg0, %c0_i32 : i32, i32
  }
}

</mosaic_0001>

<bundles_post_ra>
// kernel: tpu_custom_call.1
= control target key start
LH: loop header
LB: loop body
LE: loop exit
PB: predicated region body
PF: predicated region fallthrough
CT: control target
= control target key end

     0   :  { %vm60_vm0 = vcmask 130048   ;;  %v782_v13 = vmov 0   ;;  %s1155_s0 = inlined_call_operand.vmem [shape: f32[256,16], index: 0, kind: input, shape index: {}]   ;;  %s1156_s2 = inlined_call_operand.vmem [shape: f32[6,16,1], index: 2, kind: input, shape index: {}]   ;;  %s1157_s1 = inlined_call_operand.vmem [shape: f32[6,16,16], index: 1, kind: input, shape index: {}]   ;;  %s1158_s3 = inlined_call_operand.vmem [shape: f32[256,16], index: 3, kind: output, shape index: {}]  }
   0x1   :  { %v29_v0 = vld [vmem:[%s1155_s0 + $0x78] sm:$0xff]  ;;  %v28_v2 = vld [vmem:[%s1155_s0 + $0x70] sm:$0xff]  ;;  %v27_v4 = vld [vmem:[%s1155_s0 + $0x68] sm:$0xff]  ;;  %763 = vset.pattern.permute.xlu0 %v782_v13  ;;  %764 = vset.pattern.permute.xlu1 %v782_v13 }
   0x2   :  { %v45_v1 = vld [vmem:[%s1155_s0 + $0xf8] sm:$0xff]  ;;  %685 = vmatpush.xpose.msk.msra.mxu0 %vm60_vm0, %v29_v0  ;;  %v44_v3 = vld [vmem:[%s1155_s0 + $0xf0] sm:$0xff]  ;;  %v43_v5 = vld [vmem:[%s1155_s0 + $0xe8] sm:$0xff]  ;;  %765 = vset.pattern.permute.xlu2 %v782_v13 }
   0x3   :  { %703 = vmatpush.xpose.msk.msra.mxu1 %vm60_vm0, %v45_v1  ;;  %v26_v6 = vld [vmem:[%s1155_s0 + $0x60] sm:$0xff]  ;;  %v25_v8 = vld [vmem:[%s1155_s0 + $0x58] sm:$0xff]  ;;  %v49_v10 = vld [vmem:[%s1156_s2 + $0x8] sm:$0xff] }
   0x4   :  { %v42_v7 = vld [vmem:[%s1155_s0 + $0xe0] sm:$0xff]  ;;  %v41_v9 = vld [vmem:[%s1155_s0 + $0xd8] sm:$0xff]  ;;  %v24_v11 = vld [vmem:[%s1155_s0 + $0x50] sm:$0xff]  ;;  %57 = vperm.xlu0 %763, %v49_v10  }
   0x5   :  { %v40_v12 = vld [vmem:[%s1155_s0 + $0xd0] sm:$0xff]  ;;  %v23_v14 = vld [vmem:[%s1155_s0 + $0x48] sm:$0xff]  ;;  %v48_v16 = vld [vmem:[%s1156_s2] sm:$0xff] }
   0x6   :  { %686 = vmatpush.xpose.msk.msra.mxu0 %vm60_vm0, %v28_v2  ;;  %v39_v15 = vld [vmem:[%s1155_s0 + $0xc8] sm:$0xff]  ;;  %v22_v17 = vld [vmem:[%s1155_s0 + $0x40] sm:$0xff]  ;;  %v21_v19 = vld [vmem:[%s1155_s0 + $0x38] sm:$0xff] }
   0x7   :  { %704 = vmatpush.xpose.msk.msra.mxu1 %vm60_vm0, %v44_v3  ;;  %v38_v18 = vld [vmem:[%s1155_s0 + $0xc0] sm:$0xff]  ;;  %v37_v20 = vld [vmem:[%s1155_s0 + $0xb8] sm:$0xff]  ;;  %v20_v22 = vld [vmem:[%s1155_s0 + $0x30] sm:$0xff] }
   0x8   :  { %v740_v21 = vld [vmem:[%s1156_s2 + $0x38] sm:$0xff]  ;;  %v36_v23 = vld [vmem:[%s1155_s0 + $0xb0] sm:$0xff]  ;;  %v19_v24 = vld [vmem:[%s1155_s0 + $0x28] sm:$0xff] }
   0x9   :  { %v35_v25 = vld [vmem:[%s1155_s0 + $0xa8] sm:$0xff]  ;;  %v747_v26 = vld [vmem:[%s1156_s2 + $0x40] sm:$0xff]  ;;  %v17_v29 = vld [vmem:[%s1155_s0 + $0x18] sm:$0xff] }
   0xa   :  { %687 = vmatpush.xpose.msk.msra.mxu0 %vm60_vm0, %v27_v4  ;;  %v18_v27 = vld [vmem:[%s1155_s0 + $0x20] sm:$0xff]  ;;  %v33_v30 = vld [vmem:[%s1155_s0 + $0x98] sm:$0xff]  ;;  %v16_v31 = vld [vmem:[%s1155_s0 + $0x10] sm:$0xff] }
   0xb   :  { %705 = vmatpush.xpose.msk.msra.mxu1 %vm60_vm0, %v43_v5  ;;  %v34_v28 = vld [vmem:[%s1155_s0 + $0xa0] sm:$0xff]  ;;  %v32_v32 = vld [vmem:[%s1155_s0 + $0x90] sm:$0xff]  ;;  %v15_v33 = vld [vmem:[%s1155_s0 + $0x8] sm:$0xff] }
   0xc   :  { %52 = vperm.xlu0 %763, %v48_v16   ;;  %v31_v34 = vld [vmem:[%s1155_s0 + $0x88] sm:$0xff]  ;;  %v14_v35 = vld [vmem:[%s1155_s0] sm:$0xff]  ;;  %v724_v39 = vld [vmem:[%s1156_s2 + $0x18] sm:$0xff] }
   0xd   :  { %v30_v36 = vld [vmem:[%s1155_s0 + $0x80] sm:$0xff]  ;;  %v47_v38 = vld [vmem:[%s1157_s1 + $0x8] sm:$0xff]  ;;  %226 = vperm.xlu1 %764, %v724_v39   ;;  %v723_v40 = vld [vmem:[%s1156_s2 + $0x10] sm:$0xff] }
   0xe   :  { %688 = vmatpush.xpose.msk.msra.mxu0 %vm60_vm0, %v26_v6  ;;  %v46_v37 = vld [vmem:[%s1157_s1] sm:$0xff]  ;;  %v739_v41 = vld [vmem:[%s1156_s2 + $0x30] sm:$0xff]  ;;  %v722_v58 = vld [vmem:[%s1157_s1 + $0x18] sm:$0xff] }
   0xf   :  { %706 = vmatpush.xpose.msk.msra.mxu1 %vm60_vm0, %v42_v7  ;;  %v755_v43 = vld [vmem:[%s1156_s2 + $0x50] sm:$0xff]  ;;  %v732_v59 = vld [vmem:[%s1156_s2 + $0x28] sm:$0xff]  ;;  %v731_v61 = vld [vmem:[%s1156_s2 + $0x20] sm:$0xff] }
  0x10   :  { %v721_v57 = vld [vmem:[%s1157_s1 + $0x10] sm:$0xff]  ;;  %298 = vperm.xlu2 %765, %v732_v59   ;;  %v748_v0 = vld [vmem:[%s1156_s2 + $0x48] sm:$0xff]  ;;  %v756_v13 = vld [vmem:[%s1156_s2 + $0x58] sm:$0xff] }
  0x12   :  { %689 = vmatpush.xpose.msk.msra.mxu0 %vm60_vm0, %v25_v8 }
  0x13   :  { %707 = vmatpush.xpose.msk.msra.mxu1 %vm60_vm0, %v41_v9 }
  0x14   :  { %366 = vperm.xlu0 %763, %v740_v21  }
  0x15   :  { %221 = vperm.xlu1 %764, %v723_v40  }
  0x16   :  { %690 = vmatpush.xpose.msk.msra.mxu0 %vm60_vm0, %v24_v11 }
  0x17   :  { %708 = vmatpush.xpose.msk.msra.mxu1 %vm60_vm0, %v40_v12  ;;  %v729_v12 = vld [vmem:[%s1157_s1 + $0x20] sm:$0xff] }
  0x18   :  { %293 = vperm.xlu2 %765, %v731_v61  }
  0x1a   :  { %691 = vmatpush.xpose.msk.msra.mxu0 %vm60_vm0, %v23_v14  ;;  %v730_v14 = vld [vmem:[%s1157_s1 + $0x28] sm:$0xff] }
  0x1b   :  { %709 = vmatpush.xpose.msk.msra.mxu1 %vm60_vm0, %v39_v15 }
  0x1c   :  { %433 = vperm.xlu0 %763, %v747_v26   ;;  %v738_v26 = vld [vmem:[%s1157_s1 + $0x38] sm:$0xff] }
  0x1d   :  { %361 = vperm.xlu1 %764, %v739_v41   ;;  %v745_v41 = vld [vmem:[%s1157_s1 + $0x40] sm:$0xff] }
  0x1e   :  { %692 = vmatpush.xpose.msk.msra.mxu0 %vm60_vm0, %v22_v17 }
  0x1f   :  { %710 = vmatpush.xpose.msk.msra.mxu1 %vm60_vm0, %v38_v18 }
  0x20   :  { %438 = vperm.xlu2 %765, %v748_v0  }
  0x22   :  { %693 = vmatpush.xpose.msk.msra.mxu0 %vm60_vm0, %v21_v19 }
  0x23   :  { %711 = vmatpush.xpose.msk.msra.mxu1 %vm60_vm0, %v37_v20 }
  0x25   :  { %505 = vperm.xlu1 %764, %v755_v43  }
  0x26   :  { %694 = vmatpush.xpose.msk.msra.mxu0 %vm60_vm0, %v20_v22 }
  0x27   :  { %712 = vmatpush.xpose.msk.msra.mxu1 %vm60_vm0, %v36_v23 }
  0x28   :  { %510 = vperm.xlu2 %765, %v756_v13  }
  0x2a   :  { %695 = vmatpush.xpose.msk.msra.mxu0 %vm60_vm0, %v19_v24 }
  0x2b   :  { %713 = vmatpush.xpose.msk.msra.mxu1 %vm60_vm0, %v35_v25  ;;  %v737_v25 = vld [vmem:[%s1157_s1 + $0x30] sm:$0xff] }
  0x2e   :  { %696 = vmatpush.xpose.msk.msra.mxu0 %vm60_vm0, %v18_v27 }
  0x2f   :  { %714 = vmatpush.xpose.msk.msra.mxu1 %vm60_vm0, %v34_v28 }
  0x32   :  { %697 = vmatpush.xpose.msk.msra.mxu0 %vm60_vm0, %v17_v29 }
  0x33   :  { %715 = vmatpush.xpose.msk.msra.mxu1 %vm60_vm0, %v33_v30 }
  0x36   :  { %698 = vmatpush.xpose.msk.msra.mxu0 %vm60_vm0, %v16_v31 }
  0x37   :  { %716 = vmatpush.xpose.msk.msra.mxu1 %vm60_vm0, %v32_v32 }
  0x3a   :  { %699 = vmatpush.xpose.msk.msra.mxu0 %vm60_vm0, %v15_v33 }
  0x3b   :  { %717 = vmatpush.xpose.msk.msra.mxu1 %vm60_vm0, %v31_v34 }
  0x3e   :  { %700 = vmatpush.xpose.msk.msra.mxu0 %vm60_vm0, %v14_v35 }
  0x3f   :  { %718 = vmatpush.xpose.msk.msra.mxu1 %vm60_vm0, %v30_v36 }
  0x41   :  { %701 = vmatmul.msk.f32.vlgmr.msra.gmra.mxu0 %vm60_vm0, %v46_v37 }
  0x42   :  { %719 = vmatmul.msk.f32.vlgmr.msra.gmra.mxu1 %vm60_vm0, %v46_v37 }
  0x49   :  { %702 = vmatmul.msk.f32.gmra.mxu0 %vm60_vm0, %v47_v38 }
  0x4a   :  { %720 = vmatmul.msk.f32.gmra.mxu1 %vm60_vm0, %v47_v38 }
  0x6a   :  { %v299_v15 = vpop.permute.xlu2 %298 }
  0x72   :  { %v294_v22 = vpop.permute.xlu2 %293 }
  0x76   :  { %v58_v42 = vpop.permute.xlu0 %57 }
  0x7e   :  { %v53_v46 = vpop.permute.xlu0 %52 }
  0x7f   :  { %v227_v60 = vpop.permute.xlu1 %226 }
  0x86   :  { %v367_v29 = vpop.permute.xlu0 %366 }
  0x87   :  { %v222_v1 = vpop.permute.xlu1 %221 }
  0x8f   :  { %v362_v30 = vpop.permute.xlu1 %361 }
  0x97   :  { %v506_v59 = vpop.permute.xlu1 %505 }
  0xbe   :  { %v180_v44 = vpop.f32.mrf.mxu0 }
  0xbf   :  { %v203_v45 = vpop.f32.mrf.mxu1  ;;  %v181_v49 = vadd.f32 %v180_v44, %v53_v46 }
  0xc0   :  { %v204_v50 = vadd.f32 %v203_v45, %v53_v46  ;;  %v434_v45 = vpop.permute.xlu0 %433  ;;  %v439_v46 = vpop.permute.xlu2 %438 }
  0xc1   :  { %v209_v55 = vmax.f32 %v181_v49, 0.0 }
  0xc2   :  { %v210_v56 = vmax.f32 %v204_v50, 0.0 }
  0xc6   :  { %v183_v47 = vpop.f32.mrf.mxu0 }
  0xc7   :  { %v206_v48 = vpop.f32.mrf.mxu1  ;;  %v184_v51 = vadd.f32 %v183_v47, %v58_v42 }
  0xc8   :  { %v207_v52 = vadd.f32 %v206_v48, %v58_v42  ;;  %v746_v42 = vld [vmem:[%s1157_s1 + $0x48] sm:$0xff] }
  0xc9   :  { %v211_v53 = vmax.f32 %v184_v51, 0.0 }
  0xca   :  { %v212_v54 = vmax.f32 %v207_v52, 0.0 }
  0xcb   :  { %249 = vmatpush.msra.mxu2 %v211_v53 }
  0xcc   :  { %272 = vmatpush.msra.mxu3 %v212_v54 }
  0xcd   :  { %250 = vmatpush.msra.mxu2 %v209_v55 }
  0xce   :  { %273 = vmatpush.msra.mxu3 %v210_v56  ;;  %725 = vmatmul.msk.f32.vlgmr.msra.gmra.mxu2 %vm60_vm0, %v721_v57 }
  0xcf   :  { %727 = vmatmul.msk.f32.vlgmr.msra.gmra.mxu3 %vm60_vm0, %v721_v57  ;;  %v753_v57 = vld [vmem:[%s1157_s1 + $0x50] sm:$0xff] }
  0xd6   :  { %726 = vmatmul.msk.f32.gmra.mxu2 %vm60_vm0, %v722_v58 }
  0xd7   :  { %728 = vmatmul.msk.f32.gmra.mxu3 %vm60_vm0, %v722_v58  ;;  %v754_v58 = vld [vmem:[%s1157_s1 + $0x58] sm:$0xff] }
 0x151   :  { %v252_v62 = vpop.f32.mrf.mxu2 }
 0x152   :  { %v275_v63 = vpop.f32.mrf.mxu3  ;;  %v253_v4 = vadd.f32 %v252_v62, %v222_v1 }
 0x153   :  { %v276_v5 = vadd.f32 %v275_v63, %v222_v1 }
 0x154   :  { %v281_v10 = vmax.f32 %v253_v4, 0.0  ;;  %v511_v4 = vpop.permute.xlu2 %510 }
 0x155   :  { %v282_v11 = vmax.f32 %v276_v5, 0.0 }
 0x159   :  { %v255_v2 = vpop.f32.mrf.mxu2 }
 0x15a   :  { %v278_v3 = vpop.f32.mrf.mxu3  ;;  %v256_v6 = vadd.f32 %v255_v2, %v227_v60 }
 0x15b   :  { %v279_v7 = vadd.f32 %v278_v3, %v227_v60 }
 0x15c   :  { %v283_v8 = vmax.f32 %v256_v6, 0.0 }
 0x15d   :  { %v284_v9 = vmax.f32 %v279_v7, 0.0 }
 0x15e   :  { %321 = vmatpush.msrb.mxu2 %v283_v8 }
 0x15f   :  { %344 = vmatpush.msrb.mxu3 %v284_v9 }
 0x160   :  { %322 = vmatpush.msrb.mxu2 %v281_v10 }
 0x161   :  { %345 = vmatpush.msrb.mxu3 %v282_v11  ;;  %733 = vmatmul.msk.f32.vlgmr.msrb.gmra.mxu2 %vm60_vm0, %v729_v12 }
 0x162   :  { %735 = vmatmul.msk.f32.vlgmr.msrb.gmra.mxu3 %vm60_vm0, %v729_v12 }
 0x169   :  { %734 = vmatmul.msk.f32.gmra.mxu2 %vm60_vm0, %v730_v14 }
 0x16a   :  { %736 = vmatmul.msk.f32.gmra.mxu3 %vm60_vm0, %v730_v14 }
 0x1e4   :  { %v324_v16 = vpop.f32.mrf.mxu2 }
 0x1e5   :  { %v347_v17 = vpop.f32.mrf.mxu3  ;;  %v325_v23 = vadd.f32 %v324_v16, %v294_v22 }
 0x1e6   :  { %v348_v24 = vadd.f32 %v347_v17, %v294_v22 }
 0x1ec   :  { %v327_v18 = vpop.f32.mrf.mxu2 }
 0x1ed   :  { %v350_v19 = vpop.f32.mrf.mxu3  ;;  %v328_v20 = vadd.f32 %v327_v18, %v299_v15 }
 0x1ee   :  { %v351_v21 = vadd.f32 %v350_v19, %v299_v15 }
 0x1ef   :  { %389 = vmatpush.msra.mxu2 %v328_v20 }
 0x1f0   :  { %412 = vmatpush.msra.mxu3 %v351_v21 }
 0x1f1   :  { %390 = vmatpush.msra.mxu2 %v325_v23 }
 0x1f2   :  { %413 = vmatpush.msra.mxu3 %v348_v24  ;;  %741 = vmatmul.msk.f32.vlgmr.msra.gmra.mxu2 %vm60_vm0, %v737_v25 }
 0x1f3   :  { %743 = vmatmul.msk.f32.vlgmr.msra.gmra.mxu3 %vm60_vm0, %v737_v25 }
 0x1fa   :  { %742 = vmatmul.msk.f32.gmra.mxu2 %vm60_vm0, %v738_v26 }
 0x1fb   :  { %744 = vmatmul.msk.f32.gmra.mxu3 %vm60_vm0, %v738_v26 }
 0x275   :  { %v392_v27 = vpop.f32.mrf.mxu2 }
 0x276   :  { %v415_v28 = vpop.f32.mrf.mxu3  ;;  %v393_v33 = vadd.f32 %v392_v27, %v362_v30 }
 0x277   :  { %v416_v34 = vadd.f32 %v415_v28, %v362_v30 }
 0x278   :  { %v421_v39 = vmax.f32 %v393_v33, 0.0 }
 0x279   :  { %v422_v40 = vmax.f32 %v416_v34, 0.0 }
 0x27d   :  { %v395_v31 = vpop.f32.mrf.mxu2 }
 0x27e   :  { %v418_v32 = vpop.f32.mrf.mxu3  ;;  %v396_v35 = vadd.f32 %v395_v31, %v367_v29 }
 0x27f   :  { %v419_v36 = vadd.f32 %v418_v32, %v367_v29 }
 0x280   :  { %v423_v37 = vmax.f32 %v396_v35, 0.0 }
 0x281   :  { %v424_v38 = vmax.f32 %v419_v36, 0.0 }
 0x282   :  { %461 = vmatpush.msrb.mxu2 %v423_v37 }
 0x283   :  { %484 = vmatpush.msrb.mxu3 %v424_v38 }
 0x284   :  { %462 = vmatpush.msrb.mxu2 %v421_v39 }
 0x285   :  { %485 = vmatpush.msrb.mxu3 %v422_v40  ;;  %749 = vmatmul.msk.f32.vlgmr.msrb.gmra.mxu2 %vm60_vm0, %v745_v41 }
 0x286   :  { %751 = vmatmul.msk.f32.vlgmr.msrb.gmra.mxu3 %vm60_vm0, %v745_v41 }
 0x28d   :  { %750 = vmatmul.msk.f32.gmra.mxu2 %vm60_vm0, %v746_v42 }
 0x28e   :  { %752 = vmatmul.msk.f32.gmra.mxu3 %vm60_vm0, %v746_v42 }
 0x308   :  { %v464_v43 = vpop.f32.mrf.mxu2 }
 0x309   :  { %v487_v44 = vpop.f32.mrf.mxu3  ;;  %v465_v49 = vadd.f32 %v464_v43, %v434_v45 }
 0x30a   :  { %v488_v50 = vadd.f32 %v487_v44, %v434_v45 }
 0x30b   :  { %v493_v55 = vmax.f32 %v465_v49, 0.0 }
 0x30c   :  { %v494_v56 = vmax.f32 %v488_v50, 0.0 }
 0x310   :  { %v467_v47 = vpop.f32.mrf.mxu2 }
 0x311   :  { %v490_v48 = vpop.f32.mrf.mxu3  ;;  %v468_v51 = vadd.f32 %v467_v47, %v439_v46 }
 0x312   :  { %v491_v52 = vadd.f32 %v490_v48, %v439_v46 }
 0x313   :  { %v495_v53 = vmax.f32 %v468_v51, 0.0 }
 0x314   :  { %v496_v54 = vmax.f32 %v491_v52, 0.0 }
 0x315   :  { %533 = vmatpush.msra.mxu2 %v495_v53 }
 0x316   :  { %556 = vmatpush.msra.mxu3 %v496_v54 }
 0x317   :  { %534 = vmatpush.msra.mxu2 %v493_v55 }
 0x318   :  { %557 = vmatpush.msra.mxu3 %v494_v56  ;;  %757 = vmatmul.msk.f32.vlgmr.msra.gmra.mxu2 %vm60_vm0, %v753_v57 }
 0x319   :  { %759 = vmatmul.msk.f32.vlgmr.msra.gmra.mxu3 %vm60_vm0, %v753_v57 }
 0x320   :  { %758 = vmatmul.msk.f32.gmra.mxu2 %vm60_vm0, %v754_v58 }
 0x321   :  { %760 = vmatmul.msk.f32.gmra.mxu3 %vm60_vm0, %v754_v58 }
 0x39b   :  { %v536_v60 = vpop.f32.mrf.mxu2 }
 0x39c   :  { %v559_v61 = vpop.f32.mrf.mxu3  ;;  %v537_v62 = vadd.f32 %v536_v60, %v506_v59 }
 0x39d   :  { %v560_v63 = vadd.f32 %v559_v61, %v506_v59 }
 0x39e   :  { %v565_v0 = vsub.f32 0.0, %v537_v62 }
 0x39f   :  { %v566_v1 = vsub.f32 0.0, %v560_v63 }
 0x3a0   :  { %v569_v2 = vmul.f32 1.442695, %v565_v0 }
 0x3a1   :  { %v571_v3 = vmul.f32 1.442695, %v566_v1 }
 0x3a2   :  { %766 = vpow2.f32 %v569_v2 }
 0x3a3   :  { %768 = vpow2.f32 %v571_v3  ;;  %v539_v5 = vpop.f32.mrf.mxu2 }
 0x3a4   :  { %v562_v6 = vpop.f32.mrf.mxu3  ;;  %v540_v7 = vadd.f32 %v539_v5, %v511_v4 }
 0x3a5   :  { %v563_v8 = vadd.f32 %v562_v6, %v511_v4 }
 0x3a6   :  { %v567_v9 = vsub.f32 0.0, %v540_v7 }
 0x3a7   :  { %v568_v10 = vsub.f32 0.0, %v563_v8 }
 0x3a8   :  { %v767_v11 = vpop.eup %766  ;;  %v573_v12 = vmul.f32 1.442695, %v567_v9 }
 0x3a9   :  { %v769_v13 = vpop.eup %768  ;;  %v577_v14 = vadd.f32 1.0, %v767_v11  ;;  %v575_v15 = vmul.f32 1.442695, %v568_v10 }
 0x3aa   :  { %v578_v16 = vadd.f32 1.0, %v769_v13  ;;  %770 = vpow2.f32 %v573_v12 }
 0x3ab   :  { %772 = vrcp.f32 %v577_v14 }
 0x3ac   :  { %774 = vrcp.f32 %v578_v16 }
 0x3ad   :  { %776 = vpow2.f32 %v575_v15 }
 0x3b0   :  { %v771_v17 = vpop.eup %770 }
 0x3b1   :  { %v773_v18 = vpop.eup %772  ;;  %v579_v19 = vadd.f32 1.0, %v771_v17 }
 0x3b2   :  { %v775_v20 = vpop.eup %774  ;;  %585 = vxpose.xlu0.b32.start [1/2] (short) %v773_v18, 128 }
 0x3b3   :  { %v777_v21 = vpop.eup %776  ;;  %778 = vrcp.f32 %v579_v19  ;;  %617 = vxpose.xlu1.b32.start [1/2] (short) %v775_v20, 128 }
 0x3b4   :  { %v580_v22 = vadd.f32 1.0, %v777_v21 }
 0x3b6   :  { %780 = vrcp.f32 %v580_v22 }
 0x3b9   :  { %v779_v23 = vpop.eup %778 }
 0x3ba   :  { %586 = vxpose.xlu0.b32.end [2/2] (short) %v779_v23, 128 }
 0x3bc   :  { %v781_v24 = vpop.eup %780 }
 0x3bd   :  { %618 = vxpose.xlu1.b32.end [2/2] (short) %v781_v24, 128 }
 0x456   :  { %v601_v25 = vpop.trf.xlu0 }
 0x457   :  { %649 = vst.msk [vmem:[%s1158_s3] sm:$0xff] %vm60_vm0, %v601_v25 }
 0x459   :  { %v633_v26 = vpop.trf.xlu1 }
 0x45a   :  { %665 = vst.msk [vmem:[%s1158_s3 + $0x80] sm:$0xff] %vm60_vm0, %v633_v26 }
 0x45e   :  { %v602_v27 = vpop.trf.xlu0 }
 0x45f   :  { %650 = vst.msk [vmem:[%s1158_s3 + $0x8] sm:$0xff] %vm60_vm0, %v602_v27 }
 0x461   :  { %v634_v28 = vpop.trf.xlu1 }
 0x462   :  { %666 = vst.msk [vmem:[%s1158_s3 + $0x88] sm:$0xff] %vm60_vm0, %v634_v28 }
 0x466   :  { %v603_v29 = vpop.trf.xlu0 }
 0x467   :  { %651 = vst.msk [vmem:[%s1158_s3 + $0x10] sm:$0xff] %vm60_vm0, %v603_v29 }
 0x469   :  { %v635_v30 = vpop.trf.xlu1 }
 0x46a   :  { %667 = vst.msk [vmem:[%s1158_s3 + $0x90] sm:$0xff] %vm60_vm0, %v635_v30 }
 0x46e   :  { %v604_v31 = vpop.trf.xlu0 }
 0x46f   :  { %652 = vst.msk [vmem:[%s1158_s3 + $0x18] sm:$0xff] %vm60_vm0, %v604_v31 }
 0x471   :  { %v636_v32 = vpop.trf.xlu1 }
 0x472   :  { %668 = vst.msk [vmem:[%s1158_s3 + $0x98] sm:$0xff] %vm60_vm0, %v636_v32 }
 0x476   :  { %v605_v33 = vpop.trf.xlu0 }
 0x477   :  { %653 = vst.msk [vmem:[%s1158_s3 + $0x20] sm:$0xff] %vm60_vm0, %v605_v33 }
 0x479   :  { %v637_v34 = vpop.trf.xlu1 }
 0x47a   :  { %669 = vst.msk [vmem:[%s1158_s3 + $0xa0] sm:$0xff] %vm60_vm0, %v637_v34 }
 0x47e   :  { %v606_v35 = vpop.trf.xlu0 }
 0x47f   :  { %654 = vst.msk [vmem:[%s1158_s3 + $0x28] sm:$0xff] %vm60_vm0, %v606_v35 }
 0x481   :  { %v638_v36 = vpop.trf.xlu1 }
 0x482   :  { %670 = vst.msk [vmem:[%s1158_s3 + $0xa8] sm:$0xff] %vm60_vm0, %v638_v36 }
 0x486   :  { %v607_v37 = vpop.trf.xlu0 }
 0x487   :  { %655 = vst.msk [vmem:[%s1158_s3 + $0x30] sm:$0xff] %vm60_vm0, %v607_v37 }
 0x489   :  { %v639_v38 = vpop.trf.xlu1 }
 0x48a   :  { %671 = vst.msk [vmem:[%s1158_s3 + $0xb0] sm:$0xff] %vm60_vm0, %v639_v38 }
 0x48e   :  { %v608_v39 = vpop.trf.xlu0 }
 0x48f   :  { %656 = vst.msk [vmem:[%s1158_s3 + $0x38] sm:$0xff] %vm60_vm0, %v608_v39 }
 0x491   :  { %v640_v40 = vpop.trf.xlu1 }
 0x492   :  { %672 = vst.msk [vmem:[%s1158_s3 + $0xb8] sm:$0xff] %vm60_vm0, %v640_v40 }
 0x496   :  { %v609_v41 = vpop.trf.xlu0 }
 0x497   :  { %657 = vst.msk [vmem:[%s1158_s3 + $0x40] sm:$0xff] %vm60_vm0, %v609_v41 }
 0x499   :  { %v641_v42 = vpop.trf.xlu1 }
 0x49a   :  { %673 = vst.msk [vmem:[%s1158_s3 + $0xc0] sm:$0xff] %vm60_vm0, %v641_v42 }
 0x49e   :  { %v610_v43 = vpop.trf.xlu0 }
 0x49f   :  { %658 = vst.msk [vmem:[%s1158_s3 + $0x48] sm:$0xff] %vm60_vm0, %v610_v43 }
 0x4a1   :  { %v642_v44 = vpop.trf.xlu1 }
 0x4a2   :  { %674 = vst.msk [vmem:[%s1158_s3 + $0xc8] sm:$0xff] %vm60_vm0, %v642_v44 }
 0x4a6   :  { %v611_v45 = vpop.trf.xlu0 }
 0x4a7   :  { %659 = vst.msk [vmem:[%s1158_s3 + $0x50] sm:$0xff] %vm60_vm0, %v611_v45 }
 0x4a9   :  { %v643_v46 = vpop.trf.xlu1 }
 0x4aa   :  { %675 = vst.msk [vmem:[%s1158_s3 + $0xd0] sm:$0xff] %vm60_vm0, %v643_v46 }
 0x4ae   :  { %v612_v47 = vpop.trf.xlu0 }
 0x4af   :  { %660 = vst.msk [vmem:[%s1158_s3 + $0x58] sm:$0xff] %vm60_vm0, %v612_v47 }
 0x4b1   :  { %v644_v48 = vpop.trf.xlu1 }
 0x4b2   :  { %676 = vst.msk [vmem:[%s1158_s3 + $0xd8] sm:$0xff] %vm60_vm0, %v644_v48 }
 0x4b6   :  { %v613_v49 = vpop.trf.xlu0 }
 0x4b7   :  { %661 = vst.msk [vmem:[%s1158_s3 + $0x60] sm:$0xff] %vm60_vm0, %v613_v49 }
 0x4b9   :  { %v645_v50 = vpop.trf.xlu1 }
 0x4ba   :  { %677 = vst.msk [vmem:[%s1158_s3 + $0xe0] sm:$0xff] %vm60_vm0, %v645_v50 }
 0x4be   :  { %v614_v51 = vpop.trf.xlu0 }
 0x4bf   :  { %662 = vst.msk [vmem:[%s1158_s3 + $0x68] sm:$0xff] %vm60_vm0, %v614_v51 }
 0x4c1   :  { %v646_v52 = vpop.trf.xlu1 }
 0x4c2   :  { %678 = vst.msk [vmem:[%s1158_s3 + $0xe8] sm:$0xff] %vm60_vm0, %v646_v52 }
 0x4c6   :  { %v615_v53 = vpop.trf.xlu0 }
 0x4c7   :  { %663 = vst.msk [vmem:[%s1158_s3 + $0x70] sm:$0xff] %vm60_vm0, %v615_v53 }
 0x4c9   :  { %v647_v54 = vpop.trf.xlu1 }
 0x4ca   :  { %679 = vst.msk [vmem:[%s1158_s3 + $0xf0] sm:$0xff] %vm60_vm0, %v647_v54 }
 0x4ce   :  { %v616_v55 = vpop.trf.xlu0 }
 0x4cf   :  { %664 = vst.msk [vmem:[%s1158_s3 + $0x78] sm:$0xff] %vm60_vm0, %v616_v55 }
 0x4d1   :  { %v648_v56 = vpop.trf.xlu1 }
 0x4d2   :  { %680 = vst.msk [vmem:[%s1158_s3 + $0xf8] sm:$0xff] %vm60_vm0, %v648_v56 }

</bundles_post_ra>
